<compile_context>
chip_gen: v7x
topology: tpu7x:2x2x1
jax: 0.10.0
libtpu: 0.0.40
codegen_flags: <defaults>
</compile_context>

<pallas_src>
import jax
import jax.numpy as jnp
from jax.experimental import pallas as pl
from jax.experimental.pallas import tpu as pltpu


def densenn_kernel(x_ref, w1_ref, c1_ref, w2_ref, c2_ref, w3_ref, b3_ref,
                   o_ref):
    """Fused 3-layer MLP on one batch tile: (Linear+BN+ReLU) x2 -> Linear."""
    # x arrives f32; cast to bf16 on the VPU (free under the DMA).
    x = x_ref[...].astype(jnp.bfloat16)                    # (TB, seq_len)

    # ----- layer 1: Linear(seq_len, ndim) + folded BN + (Dropout=id) + ReLU -----
    h = jnp.dot(x, w1_ref[...], preferred_element_type=jnp.float32)
    h = jnp.maximum(h + c1_ref[...], 0.0)                  # f32 VPU

    # ----- layer 2: Linear(ndim, ndim//2) + folded BN + (Dropout=id) + ReLU -----
    h = jnp.dot(h.astype(jnp.bfloat16), w2_ref[...],
                preferred_element_type=jnp.float32)
    h = jnp.maximum(h + c2_ref[...], 0.0)

    # ----- last: Linear(ndim//2, num_classes) -----
    out = jnp.dot(h.astype(jnp.bfloat16), w3_ref[...],
                  preferred_element_type=jnp.float32)
    o_ref[...] = (out + b3_ref[...]).astype(o_ref.dtype)   # (TB, num_classes)


def densenn_forward(x, params, *, block_b=4096):
    """x: (B, seq_len) float32.  Returns (B, num_classes) float32 logits."""
    B, seq_len = x.shape
    ndim = params["w1"].shape[1]
    half = params["w2"].shape[1]
    num_classes = params["w3"].shape[1]

    # Batch tile: big (amortizes ~0.35us/step overhead), multiple of 8; cap so
    # the grid keeps >=2 "parallel" steps when the batch allows (v7x megacore).
    rnd8 = lambda n: ((n + 7) // 8) * 8
    tb = min(block_b, rnd8(B))
    if B > 8 and tb >= B:
        tb = rnd8(pl.cdiv(B, 2))
    grid = (pl.cdiv(B, tb),)

    # Advisory cost hint for the XLA scheduler (kernel is HBM-streaming bound).
    flops = 2 * B * (seq_len * ndim + ndim * half + half * num_classes)
    bytes_accessed = (B * seq_len * 4 + B * num_classes * 4                  # x, logits
                      + 2 * (seq_len * ndim + ndim * half + half * num_classes)  # bf16 W
                      + 4 * (ndim + half + num_classes))                     # f32 shifts
    cost = pl.CostEstimate(flops=flops, transcendentals=0,
                           bytes_accessed=bytes_accessed)

    const = lambda i: (0, 0)               # weights/shifts: resident in VMEM
    out = pl.pallas_call(
        densenn_kernel,
        out_shape=jax.ShapeDtypeStruct((B, num_classes), jnp.float32),
        grid=grid,
        in_specs=[
            pl.BlockSpec((tb, seq_len), lambda i: (i, 0)),   # x: batch-tiled f32
            pl.BlockSpec((seq_len, ndim), const),            # w1'
            pl.BlockSpec((1, ndim), const),                  # c1
            pl.BlockSpec((ndim, half), const),               # w2'
            pl.BlockSpec((1, half), const),                  # c2
            pl.BlockSpec((half, num_classes), const),        # w3
            pl.BlockSpec((1, num_classes), const),           # b3
        ],
        out_specs=pl.BlockSpec((tb, num_classes), lambda i: (i, 0)),
        compiler_params=pltpu.CompilerParams(
            dimension_semantics=("parallel",),               # megacore on v7x
            vmem_limit_bytes=32 * 1024 * 1024,               # safe on v5e/v6e/v7x
        ),
        cost_estimate=cost,
    )(
        x,                                                   # f32; cast in-kernel
        params["w1"], params["c1"],
        params["w2"], params["c2"],
        params["w3"], params["b3"],
    )
    return out


def init_params(key, seq_len, num_classes, ndim):
    """PyTorch-shaped params with BatchNorm folded into the Linear layers.

    Linear weights are stored transposed (in_features, out_features) and in
    bf16 for the MXU.  BatchNorm1d (eval: running_mean=0, running_var=1) is
    folded as  s = gamma / sqrt(var + eps),  W' = W * s,  c = b * s + beta.
    """
    half = int(ndim / 2)
    eps = 1e-5
    ks = jax.random.split(key, 10)

    def lin(kw, kb, fan_in, fan_out):
        bound = 1.0 / jnp.sqrt(jnp.float32(fan_in))
        w = jax.random.uniform(kw, (fan_in, fan_out), jnp.float32, -bound, bound)
        b = jax.random.uniform(kb, (1, fan_out), jnp.float32, -bound, bound)
        return w, b

    w1, b1 = lin(ks[0], ks[1], seq_len, ndim)
    w2, b2 = lin(ks[2], ks[3], ndim, half)
    w3, b3 = lin(ks[4], ks[5], half, num_classes)

    # BN affine params (deterministic, not all-ones so the fold is exercised).
    g1 = 1.0 + 0.1 * jax.random.normal(ks[6], (1, ndim), jnp.float32)
    be1 = 0.1 * jax.random.normal(ks[7], (1, ndim), jnp.float32)
    g2 = 1.0 + 0.1 * jax.random.normal(ks[8], (1, half), jnp.float32)
    be2 = 0.1 * jax.random.normal(ks[9], (1, half), jnp.float32)

    rm1 = jnp.zeros((1, ndim), jnp.float32)
    rv1 = jnp.ones((1, ndim), jnp.float32)
    rm2 = jnp.zeros((1, half), jnp.float32)
    rv2 = jnp.ones((1, half), jnp.float32)

    s1 = g1 / jnp.sqrt(rv1 + eps)
    t1 = be1 - rm1 * s1
    s2 = g2 / jnp.sqrt(rv2 + eps)
    t2 = be2 - rm2 * s2

    # Fold BN into the linears.
    w1f = w1 * s1            # scale columns
    c1 = b1 * s1 + t1
    w2f = w2 * s2
    c2 = b2 * s2 + t2

    return {
        # kernel params (matmul operands in bf16, shifts/bias in f32)
        "w1": w1f.astype(jnp.bfloat16), "c1": c1,
        "w2": w2f.astype(jnp.bfloat16), "c2": c2,
        "w3": w3.astype(jnp.bfloat16), "b3": b3,
    }


def densenn_ref(x, p):
    """Pure-JAX reference matching the kernel's bf16-matmul / f32-accumulate path."""
    f32 = lambda a: a.astype(jnp.float32)
    xb = x.astype(jnp.bfloat16)
    h = jnp.maximum(jnp.dot(f32(xb), f32(p["w1"])) + p["c1"], 0.0)
    h = jnp.maximum(jnp.dot(f32(h.astype(jnp.bfloat16)), f32(p["w2"])) + p["c2"], 0.0)
    return jnp.dot(f32(h.astype(jnp.bfloat16)), f32(p["w3"])) + p["b3"]


if __name__ == "__main__":
    # Small shapes consistent with the module: batch=8, seq_len=8,
    # ndim=32 (hidden), num_classes=4.
    B, SEQ_LEN, NDIM, NUM_CLASSES = 8, 8, 32, 4

    key = jax.random.PRNGKey(0)
    kx, kp, kx2 = jax.random.split(key, 3)
    x = jax.random.normal(kx, (B, SEQ_LEN), jnp.float32)
    params = init_params(kp, SEQ_LEN, NUM_CLASSES, NDIM)

    out = densenn_forward(x, params)
    out = jax.block_until_ready(out)
    ref = densenn_ref(x, params)
    assert out.shape == (B, NUM_CLASSES)
    assert jnp.allclose(out, ref, atol=1e-3, rtol=1e-3), "mismatch vs reference"

    # Second check: multi-step grid with B % tb != 0 (OOB block clamp/clip path).
    B2 = 24
    x2 = jax.random.normal(kx2, (B2, SEQ_LEN), jnp.float32)
    out2 = jax.block_until_ready(densenn_forward(x2, params, block_b=16))
    ref2 = densenn_ref(x2, params)
    assert out2.shape == (B2, NUM_CLASSES)
    assert jnp.allclose(out2, ref2, atol=1e-3, rtol=1e-3), "mismatch vs reference (ragged batch)"

    print("KERNEL_OK")
</pallas_src>

<mosaic_0001>
module attributes {stable_mosaic.version = 11 : i64} {
  func.func @densenn_kernel(%arg0: i32, %arg1: memref<8x8xf32, #tpu.memory_space<vmem>>, %arg2: memref<8x32xbf16, #tpu.memory_space<vmem>>, %arg3: memref<1x32xf32, #tpu.memory_space<vmem>>, %arg4: memref<32x16xbf16, #tpu.memory_space<vmem>>, %arg5: memref<1x16xf32, #tpu.memory_space<vmem>>, %arg6: memref<16x4xbf16, #tpu.memory_space<vmem>>, %arg7: memref<1x4xf32, #tpu.memory_space<vmem>>, %arg8: memref<8x4xf32, #tpu.memory_space<vmem>>) attributes {dimension_semantics = [#tpu.dimension_semantics<parallel>], iteration_bounds = array<i64: 1>, scalar_prefetch = 0 : i64, scratch_operands = 0 : i64, tpu.core_type = #tpu.core_type<tc>, window_params = [{transform_indices = @transform_0, window_bounds = array<i64: 8, 8>}, {pipeline_mode = #tpu.pipeline_mode<synchronous>, transform_indices = @transform_1, window_bounds = array<i64: 8, 32>}, {pipeline_mode = #tpu.pipeline_mode<synchronous>, transform_indices = @transform_2, window_bounds = array<i64: 1, 32>}, {pipeline_mode = #tpu.pipeline_mode<synchronous>, transform_indices = @transform_3, window_bounds = array<i64: 32, 16>}, {pipeline_mode = #tpu.pipeline_mode<synchronous>, transform_indices = @transform_4, window_bounds = array<i64: 1, 16>}, {pipeline_mode = #tpu.pipeline_mode<synchronous>, transform_indices = @transform_5, window_bounds = array<i64: 16, 4>}, {pipeline_mode = #tpu.pipeline_mode<synchronous>, transform_indices = @transform_6, window_bounds = array<i64: 1, 4>}, {transform_indices = @transform_7, window_bounds = array<i64: 8, 4>}]} {
    %c0 = arith.constant 0 : index
    %c0_0 = arith.constant 0 : index
    %0 = vector.load %arg1[%c0, %c0_0] : memref<8x8xf32, #tpu.memory_space<vmem>>, vector<8x8xf32>
    %1 = arith.truncf %0 : vector<8x8xf32> to vector<8x8xbf16>
    %c0_1 = arith.constant 0 : index
    %c0_2 = arith.constant 0 : index
    %2 = vector.load %arg2[%c0_1, %c0_2] : memref<8x32xbf16, #tpu.memory_space<vmem>>, vector<8x32xbf16>
    %cst = arith.constant dense<0.000000e+00> : vector<8x32xf32>
    %3 = tpu.matmul %1, %2, %cst {dimension_numbers = #tpu.dot_dimension_numbers<[1], [0], [0], [1], [0, 0, 1, 1], [], []>} : vector<8x8xbf16>, vector<8x32xbf16>, vector<8x32xf32> -> vector<8x32xf32>
    %c0_3 = arith.constant 0 : index
    %c0_4 = arith.constant 0 : index
    %4 = vector.load %arg3[%c0_3, %c0_4] : memref<1x32xf32, #tpu.memory_space<vmem>>, vector<1x32xf32>
    %5 = vector.broadcast %4 : vector<1x32xf32> to vector<8x32xf32>
    %6 = arith.addf %3, %5 : vector<8x32xf32>
    %cst_5 = arith.constant 0.000000e+00 : f32
    %7 = vector.broadcast %cst_5 : f32 to vector<8x32xf32>
    %8 = arith.maximumf %6, %7 : vector<8x32xf32>
    %9 = arith.truncf %8 : vector<8x32xf32> to vector<8x32xbf16>
    %c0_6 = arith.constant 0 : index
    %c0_7 = arith.constant 0 : index
    %10 = vector.load %arg4[%c0_6, %c0_7] : memref<32x16xbf16, #tpu.memory_space<vmem>>, vector<32x16xbf16>
    %cst_8 = arith.constant dense<0.000000e+00> : vector<8x16xf32>
    %11 = tpu.matmul %9, %10, %cst_8 {dimension_numbers = #tpu.dot_dimension_numbers<[1], [0], [0], [1], [0, 0, 1, 1], [], []>} : vector<8x32xbf16>, vector<32x16xbf16>, vector<8x16xf32> -> vector<8x16xf32>
    %c0_9 = arith.constant 0 : index
    %c0_10 = arith.constant 0 : index
    %12 = vector.load %arg5[%c0_9, %c0_10] : memref<1x16xf32, #tpu.memory_space<vmem>>, vector<1x16xf32>
    %13 = vector.broadcast %12 : vector<1x16xf32> to vector<8x16xf32>
    %14 = arith.addf %11, %13 : vector<8x16xf32>
    %cst_11 = arith.constant 0.000000e+00 : f32
    %15 = vector.broadcast %cst_11 : f32 to vector<8x16xf32>
    %16 = arith.maximumf %14, %15 : vector<8x16xf32>
    %17 = arith.truncf %16 : vector<8x16xf32> to vector<8x16xbf16>
    %c0_12 = arith.constant 0 : index
    %c0_13 = arith.constant 0 : index
    %18 = vector.load %arg6[%c0_12, %c0_13] : memref<16x4xbf16, #tpu.memory_space<vmem>>, vector<16x4xbf16>
    %cst_14 = arith.constant dense<0.000000e+00> : vector<8x4xf32>
    %19 = tpu.matmul %17, %18, %cst_14 {dimension_numbers = #tpu.dot_dimension_numbers<[1], [0], [0], [1], [0, 0, 1, 1], [], []>} : vector<8x16xbf16>, vector<16x4xbf16>, vector<8x4xf32> -> vector<8x4xf32>
    %c0_15 = arith.constant 0 : index
    %c0_16 = arith.constant 0 : index
    %20 = vector.load %arg7[%c0_15, %c0_16] : memref<1x4xf32, #tpu.memory_space<vmem>>, vector<1x4xf32>
    %21 = vector.broadcast %20 : vector<1x4xf32> to vector<8x4xf32>
    %22 = arith.addf %19, %21 : vector<8x4xf32>
    %c0_17 = arith.constant 0 : index
    %c0_18 = arith.constant 0 : index
    %23 = vector.load %arg8[%c0_17, %c0_18] : memref<8x4xf32, #tpu.memory_space<vmem>>, vector<8x4xf32>
    tpu.vector_store %arg8[%c0_17, %c0_18], %22 {strides = array<i32>} : memref<8x4xf32, #tpu.memory_space<vmem>>, vector<8x4xf32>,
    return
  }
  func.func @transform_0(%arg0: i32) -> (i32, i32) {
    %c0_i32 = arith.constant 0 : i32
    %c0_i32_0 = arith.constant 0 : i32
    return %arg0, %c0_i32 : i32, i32
  }
  func.func @transform_1(%arg0: i32) -> (i32, i32) {
    %c0_i32 = arith.constant 0 : i32
    %c0_i32_0 = arith.constant 0 : i32
    %c0_i32_1 = arith.constant 0 : i32
    return %c0_i32, %c0_i32_0 : i32, i32
  }
  func.func @transform_2(%arg0: i32) -> (i32, i32) {
    %c0_i32 = arith.constant 0 : i32
    %c0_i32_0 = arith.constant 0 : i32
    %c0_i32_1 = arith.constant 0 : i32
    return %c0_i32, %c0_i32_0 : i32, i32
  }
  func.func @transform_3(%arg0: i32) -> (i32, i32) {
    %c0_i32 = arith.constant 0 : i32
    %c0_i32_0 = arith.constant 0 : i32
    %c0_i32_1 = arith.constant 0 : i32
    return %c0_i32, %c0_i32_0 : i32, i32
  }
  func.func @transform_4(%arg0: i32) -> (i32, i32) {
    %c0_i32 = arith.constant 0 : i32
    %c0_i32_0 = arith.constant 0 : i32
    %c0_i32_1 = arith.constant 0 : i32
    return %c0_i32, %c0_i32_0 : i32, i32
  }
  func.func @transform_5(%arg0: i32) -> (i32, i32) {
    %c0_i32 = arith.constant 0 : i32
    %c0_i32_0 = arith.constant 0 : i32
    %c0_i32_1 = arith.constant 0 : i32
    return %c0_i32, %c0_i32_0 : i32, i32
  }
  func.func @transform_6(%arg0: i32) -> (i32, i32) {
    %c0_i32 = arith.constant 0 : i32
    %c0_i32_0 = arith.constant 0 : i32
    %c0_i32_1 = arith.constant 0 : i32
    return %c0_i32, %c0_i32_0 : i32, i32
  }
  func.func @transform_7(%arg0: i32) -> (i32, i32) {
    %c0_i32 = arith.constant 0 : i32
    %c0_i32_0 = arith.constant 0 : i32
    return %arg0, %c0_i32 : i32, i32
  }
}

</mosaic_0001>

<bundles_post_ra>
// kernel: tpu_custom_call.1
= control target key start
LH: loop header
LB: loop body
LE: loop exit
PB: predicated region body
PF: predicated region fallthrough
CT: control target
= control target key end

     0   :  { %vm41_vm0 = vcmask 1043456   ;;  %v262_v0 = vmov 0.0   ;;  %vm263_vm1 = vmmov 0   ;;  %vm37_vm2 = vcmask 64512   ;;  %s331_s1 = inlined_call_operand.vmem [shape: bf16[8,32], index: 1, kind: input, shape index: {}]   ;;  %s332_s0 = inlined_call_operand.vmem [shape: f32[8,8], index: 0, kind: input, shape index: {}]   ;;  %s333_s3 = inlined_call_operand.vmem [shape: bf16[32,16], index: 3, kind: input, shape index: {}]   ;;  %s334_s5 = inlined_call_operand.vmem [shape: bf16[16,4], index: 5, kind: input, shape index: {}]   ;;  %s335_s2 = inlined_call_operand.vmem [shape: f32[1,32], index: 2, kind: input, shape index: {}]   ;;  %s336_s4 = inlined_call_operand.vmem [shape: f32[1,16], index: 4, kind: input, shape index: {}]   ;;  %s337_s6 = inlined_call_operand.vmem [shape: f32[1,4], index: 6, kind: input, shape index: {}]   ;;  %s338_s7 = inlined_call_operand.vmem [shape: f32[8,4], index: 7, kind: output, shape index: {}]  }
   0x1   :  { %237 = vmatprep.subr.bf16.mxu0 %v262_v0  ;;  %v29_v1 = vld [vmem:[%s331_s1] sm:$0xf]  ;;  %239 = vmatprep.mubr.msk.bf16.mxu0 %vm263_vm1, %v262_v0  ;;  %v260_v6 = vld [vmem:[%s333_s3 + $0x8] sm:$0xff]   ;;  %vm110_vm3 = vcmask 261120   ;;  %vm171_vm4 = vcmask 130048   ;;  %vm215_vm5 = vcmask 31744  }
   0x2   :  { %v27_v2 = vld [vmem:[%s332_s0] sm:$0xff]  ;;  %v43_v3 = vsel %vm41_vm0, %v29_v1, 0  ;;  %243 = vmatprep.subr.bf16.mxu1 %v262_v0  ;;  %247 = vmatprep.mubr.msk.bf16.mxu1 %vm263_vm1, %v262_v0 }
   0x3   :  { %v28_v4 = vpack.c.bf16 %v27_v2, %v27_v2  ;;  %238 = vmatpush3.bf16.msra.mxu0 %v43_v3  ;;  %v259_v5 = vld [vmem:[%s333_s3] sm:$0xff]  }
   0x4   :  { %251 = vmatprep.subr.bf16.mxu0 %v262_v0  ;;  %244 = vmatpush3.bf16.msra.mxu1 %v259_v5  ;;  %v261_v7 = vld [vmem:[%s334_s5] sm:$0xff]  }
   0x5   :  { %245 = vmatprep.subr.bf16.mxu1 %v262_v0  ;;  %v221_v8 = vld [vmem:[%s335_s2] ss:$0 sm:$0xff] }
   0x6   :  { %240 = vmatmul.mubr.msk.bf16.vlgmr.msra.gmra.mrb[0].mxu0 %vm37_vm2, %v28_v4  ;;  %v223_v16 = vld [vmem:[%s336_s4] ss:$0 sm:$0xff] }
   0x7   :  { %253 = vmatprep.mubr.msk.bf16.mxu0 %vm263_vm1, %v262_v0  ;;  %252 = vmatpush3.bf16.msra.mxu0 %v261_v7  ;;  %v227_v24 = vld [vmem:[%s337_s6] ss:$0 sm:$0xff] }
   0x8   :  { %246 = vmatpush3.bf16.msra.mxu1 %v260_v6 }
  0xd9   :  { %v79_v9 = vpop.f32.mrb[0].mxu0 }
  0xda   :  { %v80_v10 = vadd.f32 %v221_v8, %v79_v9  ;;  %v241_v11 = vpop.f32.mrb[1].mxu0 }
  0xdb   :  { %v82_v12 = vpop.f32.mrb[2].mxu0 }
  0xdc   :  { %v85_v13 = vmax.f32 %v80_v10, 0.0  ;;  %v242_v14 = vpop.f32.mrb[3].mxu0 }
  0xde   :  { %v86_v15 = vpack.c.bf16 %v85_v13, %v85_v13 }
  0xe0   :  { %248 = vmatmul.mubr.msk.bf16.vlgmr.msra.gmra.mrb[0].mxu1 %vm110_vm3, %v86_v15 }
 0x1b3   :  { %v148_v17 = vpop.f32.mrb[0].mxu1 }
 0x1b4   :  { %v149_v18 = vadd.f32 %v223_v16, %v148_v17  ;;  %v249_v19 = vpop.f32.mrb[1].mxu1 }
 0x1b5   :  { %v151_v20 = vpop.f32.mrb[2].mxu1 }
 0x1b6   :  { %v154_v21 = vmax.f32 %v149_v18, 0.0  ;;  %v250_v22 = vpop.f32.mrb[3].mxu1 }
 0x1b8   :  { %v155_v23 = vpack.c.bf16 %v154_v21, %v154_v21 }
 0x1ba   :  { %254 = vmatmul.mubr.msk.bf16.vlgmr.msra.gmra.mrb[4].mxu0 %vm171_vm4, %v155_v23 }
 0x28d   :  { %v209_v25 = vpop.f32.mrb[4].mxu0 }
 0x28e   :  { %v210_v26 = vadd.f32 %v227_v24, %v209_v25  ;;  %v255_v27 = vpop.f32.mrb[5].mxu0 }
 0x28f   :  { %v212_v28 = vpop.f32.mrb[6].mxu0 }
 0x290   :  { %216 = vst.msk [vmem:[%s338_s7] sm:$0xff] %vm215_vm5, %v210_v26  ;;  %v256_v29 = vpop.f32.mrb[7].mxu0 }

</bundles_post_ra>
